<compile_context>
chip_gen: v5e
topology: v5e:2x2
jax: 0.10.0
libtpu: 0.0.40
codegen_flags: <defaults>
</compile_context>

<pallas_src>
import functools

import jax
import jax.numpy as jnp
from jax.experimental import pallas as pl
from jax.experimental.pallas import tpu as pltpu


def _binarizer_kernel(*refs, cin, cout, training):
    """One (Cin, tl) tile of pixels -> (Cout, tl) binarized outputs.

    refs (training):  x_ref (Cin, tl) VMEM, w_ref (Cout, Cin) SMEM,
                      u_ref (Cout, tl) VMEM uniforms, o_ref (Cout, tl) VMEM.
    refs (eval):      x_ref, w_ref, o_ref.
    """
    if training:
        x_ref, w_ref, u_ref, o_ref = refs
    else:
        x_ref, w_ref, o_ref = refs
        u_ref = None

    # Fully unrolled channel mix: Cout x Cin scalar(SMEM) * vector(VPU) FMAs.
    for co in range(cout):
        acc = x_ref[0:1, :] * w_ref[co, 0]                      # (1, tl)
        for ci in range(1, cin):
            acc = acc + x_ref[ci:ci + 1, :] * w_ref[co, ci]

        if training:
            # SoftSignFunction on tanh(conv): +1 where (1 - t)/2 <= u else -1.
            t = jnp.tanh(acc)
            row = jnp.where((1.0 - t) * 0.5 <= u_ref[co:co + 1, :], 1.0, -1.0)
        else:
            # Eval path: sign(tanh(y)) == sign(y) exactly (tanh odd & monotone),
            # so skip the EUP transcendental.  sign(0) == 0, matching torch.
            row = jnp.sign(acc)

        o_ref[co:co + 1, :] = row.astype(o_ref.dtype)


def binarizer_forward(x_nchw, weight, *, key=None, training=True, tile_l=16384):
    """Pallas implementation of Binarizer.forward.

    x_nchw : (N, Cin, H, W) float32
    weight : (Cout, Cin, 1, 1) float32   (nn.Conv2d kernel_size=1, bias=False, groups=1)
    key    : jax PRNG key for the stochastic sign (training only)
    returns: (N, Cout, H, W) float32, values in {-1,+1} (training) / {-1,0,+1} (eval)
    """
    N, Cin, H, W = x_nchw.shape
    Cout = weight.shape[0]
    HW = H * W

    x3 = x_nchw.reshape(N, Cin, HW).astype(jnp.float32)          # no transpose
    w2 = weight.reshape(Cout, Cin).astype(jnp.float32)

    # Balanced lane tiling: pick n_l tiles, each a multiple of 128 lanes, and pad
    # the spatial axis to n_l * tl (padding is sliced off after the kernel).
    n_l = -(-HW // tile_l)                                       # number of lane tiles
    tl = (-(-HW // n_l) + 127) // 128 * 128                      # per-tile lanes (mult. of 128)
    HWpad = n_l * tl
    if HWpad != HW:
        x3 = jnp.pad(x3, ((0, 0), (0, 0), (0, HWpad - HW)))

    grid = (N, n_l)
    x_spec = pl.BlockSpec((None, Cin, tl), lambda n, l: (n, 0, l))
    w_spec = pl.BlockSpec(memory_space=pltpu.MemorySpace.SMEM)   # whole (Cout, Cin) in SMEM
    o_spec = pl.BlockSpec((None, Cout, tl), lambda n, l: (n, 0, l))

    kernel = functools.partial(_binarizer_kernel, cin=Cin, cout=Cout, training=training)

    if training:
        if key is None:
            key = jax.random.PRNGKey(0)
        # Same distribution as torch.Tensor.uniform_() in SoftSignFunction.
        u = jax.random.uniform(key, (N, Cout, HWpad), dtype=jnp.float32)
        in_specs = [x_spec, w_spec,
                    pl.BlockSpec((None, Cout, tl), lambda n, l: (n, 0, l))]
        args = (x3, w2, u)
    else:
        in_specs = [x_spec, w_spec]
        args = (x3, w2)

    out3 = pl.pallas_call(
        kernel,
        out_shape=jax.ShapeDtypeStruct((N, Cout, HWpad), jnp.float32),
        grid_spec=pl.GridSpec(grid=grid, in_specs=in_specs, out_specs=o_spec),
        compiler_params=pltpu.CompilerParams(
            # Every (n, l) tile is independent (randoms are an input, no carried
            # state), so both axes can shard across TensorCores on v7x megacore.
            dimension_semantics=("parallel", "parallel"),
        ),
    )(*args)

    return out3[:, :, :HW].reshape(N, Cout, H, W)


if __name__ == "__main__":
    key = jax.random.PRNGKey(0)
    kx, kw, ku = jax.random.split(key, 3)

    # Shapes implied by the module: NCHW input, 1x1 conv in_channels -> out_channels.
    N, Cin, H, W = 2, 4, 16, 16
    Cout = 4

    x = jax.random.normal(kx, (N, Cin, H, W), dtype=jnp.float32)
    weight = jax.random.normal(kw, (Cout, Cin, 1, 1), dtype=jnp.float32) * (1.0 / jnp.sqrt(Cin))

    # Training path (default nn.Module mode): stochastic binarization.
    y_train = binarizer_forward(x, weight, key=ku, training=True)
    y_train = jax.block_until_ready(y_train)

    # Eval path: deterministic sign(tanh(conv(x))).
    y_eval = binarizer_forward(x, weight, training=False)
    y_eval = jax.block_until_ready(y_eval)

    # Sanity checks.
    assert y_train.shape == (N, Cout, H, W)
    assert y_eval.shape == (N, Cout, H, W)
    assert bool(jnp.all(jnp.abs(y_train) == 1.0))      # training values in {-1, +1}
    assert bool(jnp.all(jnp.abs(y_eval) <= 1.0))       # eval values in {-1, 0, +1}
    # Eval path must match a pure-JAX reference.
    ref = jnp.sign(jnp.tanh(jnp.einsum("nchw,oc->nohw", x, weight.reshape(Cout, Cin))))
    assert bool(jnp.allclose(y_eval, ref, atol=1e-5))

    print("KERNEL_OK")
</pallas_src>

<mosaic_0001>
module attributes {stable_mosaic.version = 11 : i64} {
  func.func @_binarizer_kernel(%arg0: i32, %arg1: i32, %arg2: memref<1x4x256xf32, #tpu.memory_space<vmem>>, %arg3: memref<4x4xf32, #tpu.memory_space<smem>>, %arg4: memref<1x4x256xf32, #tpu.memory_space<vmem>>, %arg5: memref<1x4x256xf32, #tpu.memory_space<vmem>>) attributes {dimension_semantics = [#tpu.dimension_semantics<parallel>, #tpu.dimension_semantics<parallel>], iteration_bounds = array<i64: 2, 1>, scalar_prefetch = 0 : i64, scratch_operands = 0 : i64, tpu.core_type = #tpu.core_type<tc>, window_params = [{transform_indices = @transform_0, window_bounds = array<i64: 1, 4, 256>}, {transform_indices = @transform_1, window_bounds = array<i64: 4, 4>}, {transform_indices = @transform_2, window_bounds = array<i64: 1, 4, 256>}, {transform_indices = @transform_3, window_bounds = array<i64: 1, 4, 256>}]} {
    %c0 = arith.constant 0 : index
    %c0_0 = arith.constant 0 : index
    %c0_1 = arith.constant 0 : index
    %0 = vector.load %arg2[%c0, %c0_0, %c0_1] : memref<1x4x256xf32, #tpu.memory_space<vmem>>, vector<1x1x256xf32>
    %1 = vector.shape_cast %0 : vector<1x1x256xf32> to vector<1x256xf32>
    %c0_2 = arith.constant 0 : index
    %c0_3 = arith.constant 0 : index
    %2 = memref.load %arg3[%c0_2, %c0_3] : memref<4x4xf32, #tpu.memory_space<smem>>
    %3 = vector.broadcast %2 : f32 to vector<1x256xf32>
    %4 = arith.mulf %1, %3 : vector<1x256xf32>
    %c0_4 = arith.constant 0 : index
    %c1 = arith.constant 1 : index
    %c0_5 = arith.constant 0 : index
    %5 = vector.load %arg2[%c0_4, %c1, %c0_5] : memref<1x4x256xf32, #tpu.memory_space<vmem>>, vector<1x1x256xf32>
    %6 = vector.shape_cast %5 : vector<1x1x256xf32> to vector<1x256xf32>
    %c0_6 = arith.constant 0 : index
    %c1_7 = arith.constant 1 : index
    %7 = memref.load %arg3[%c0_6, %c1_7] : memref<4x4xf32, #tpu.memory_space<smem>>
    %8 = vector.broadcast %7 : f32 to vector<1x256xf32>
    %9 = arith.mulf %6, %8 : vector<1x256xf32>
    %10 = arith.addf %4, %9 : vector<1x256xf32>
    %c0_8 = arith.constant 0 : index
    %c2 = arith.constant 2 : index
    %c0_9 = arith.constant 0 : index
    %11 = vector.load %arg2[%c0_8, %c2, %c0_9] : memref<1x4x256xf32, #tpu.memory_space<vmem>>, vector<1x1x256xf32>
    %12 = vector.shape_cast %11 : vector<1x1x256xf32> to vector<1x256xf32>
    %c0_10 = arith.constant 0 : index
    %c2_11 = arith.constant 2 : index
    %13 = memref.load %arg3[%c0_10, %c2_11] : memref<4x4xf32, #tpu.memory_space<smem>>
    %14 = vector.broadcast %13 : f32 to vector<1x256xf32>
    %15 = arith.mulf %12, %14 : vector<1x256xf32>
    %16 = arith.addf %10, %15 : vector<1x256xf32>
    %c0_12 = arith.constant 0 : index
    %c3 = arith.constant 3 : index
    %c0_13 = arith.constant 0 : index
    %17 = vector.load %arg2[%c0_12, %c3, %c0_13] : memref<1x4x256xf32, #tpu.memory_space<vmem>>, vector<1x1x256xf32>
    %18 = vector.shape_cast %17 : vector<1x1x256xf32> to vector<1x256xf32>
    %c0_14 = arith.constant 0 : index
    %c3_15 = arith.constant 3 : index
    %19 = memref.load %arg3[%c0_14, %c3_15] : memref<4x4xf32, #tpu.memory_space<smem>>
    %20 = vector.broadcast %19 : f32 to vector<1x256xf32>
    %21 = arith.mulf %18, %20 : vector<1x256xf32>
    %22 = arith.addf %16, %21 : vector<1x256xf32>
    %23 = math.tanh %22 : vector<1x256xf32>
    %cst = arith.constant 1.000000e+00 : f32
    %24 = vector.broadcast %cst : f32 to vector<1x256xf32>
    %25 = arith.subf %24, %23 : vector<1x256xf32>
    %cst_16 = arith.constant 5.000000e-01 : f32
    %26 = vector.broadcast %cst_16 : f32 to vector<1x256xf32>
    %27 = arith.mulf %25, %26 : vector<1x256xf32>
    %c0_17 = arith.constant 0 : index
    %c0_18 = arith.constant 0 : index
    %c0_19 = arith.constant 0 : index
    %28 = vector.load %arg4[%c0_17, %c0_18, %c0_19] : memref<1x4x256xf32, #tpu.memory_space<vmem>>, vector<1x1x256xf32>
    %29 = vector.shape_cast %28 : vector<1x1x256xf32> to vector<1x256xf32>
    %30 = arith.cmpf ole, %27, %29 : vector<1x256xf32>
    %cst_20 = arith.constant 1.000000e+00 : f32
    %cst_21 = arith.constant -1.000000e+00 : f32
    %31 = vector.broadcast %cst_20 : f32 to vector<1x256xf32>
    %32 = vector.broadcast %cst_21 : f32 to vector<1x256xf32>
    %33 = arith.select %30, %31, %32 : vector<1x256xi1>, vector<1x256xf32>
    %c0_22 = arith.constant 0 : index
    %c0_23 = arith.constant 0 : index
    %c0_24 = arith.constant 0 : index
    %34 = vector.load %arg5[%c0_22, %c0_23, %c0_24] : memref<1x4x256xf32, #tpu.memory_space<vmem>>, vector<1x1x256xf32>
    %35 = vector.shape_cast %34 : vector<1x1x256xf32> to vector<1x256xf32>
    %36 = vector.shape_cast %33 : vector<1x256xf32> to vector<1x1x256xf32>
    tpu.vector_store %arg5[%c0_22, %c0_23, %c0_24], %36 {strides = array<i32>} : memref<1x4x256xf32, #tpu.memory_space<vmem>>, vector<1x1x256xf32>,
    %c0_25 = arith.constant 0 : index
    %c0_26 = arith.constant 0 : index
    %c0_27 = arith.constant 0 : index
    %37 = vector.load %arg2[%c0_25, %c0_26, %c0_27] : memref<1x4x256xf32, #tpu.memory_space<vmem>>, vector<1x1x256xf32>
    %38 = vector.shape_cast %37 : vector<1x1x256xf32> to vector<1x256xf32>
    %c1_28 = arith.constant 1 : index
    %c0_29 = arith.constant 0 : index
    %39 = memref.load %arg3[%c1_28, %c0_29] : memref<4x4xf32, #tpu.memory_space<smem>>
    %40 = vector.broadcast %39 : f32 to vector<1x256xf32>
    %41 = arith.mulf %38, %40 : vector<1x256xf32>
    %c0_30 = arith.constant 0 : index
    %c1_31 = arith.constant 1 : index
    %c0_32 = arith.constant 0 : index
    %42 = vector.load %arg2[%c0_30, %c1_31, %c0_32] : memref<1x4x256xf32, #tpu.memory_space<vmem>>, vector<1x1x256xf32>
    %43 = vector.shape_cast %42 : vector<1x1x256xf32> to vector<1x256xf32>
    %c1_33 = arith.constant 1 : index
    %c1_34 = arith.constant 1 : index
    %44 = memref.load %arg3[%c1_33, %c1_34] : memref<4x4xf32, #tpu.memory_space<smem>>
    %45 = vector.broadcast %44 : f32 to vector<1x256xf32>
    %46 = arith.mulf %43, %45 : vector<1x256xf32>
    %47 = arith.addf %41, %46 : vector<1x256xf32>
    %c0_35 = arith.constant 0 : index
    %c2_36 = arith.constant 2 : index
    %c0_37 = arith.constant 0 : index
    %48 = vector.load %arg2[%c0_35, %c2_36, %c0_37] : memref<1x4x256xf32, #tpu.memory_space<vmem>>, vector<1x1x256xf32>
    %49 = vector.shape_cast %48 : vector<1x1x256xf32> to vector<1x256xf32>
    %c1_38 = arith.constant 1 : index
    %c2_39 = arith.constant 2 : index
    %50 = memref.load %arg3[%c1_38, %c2_39] : memref<4x4xf32, #tpu.memory_space<smem>>
    %51 = vector.broadcast %50 : f32 to vector<1x256xf32>
    %52 = arith.mulf %49, %51 : vector<1x256xf32>
    %53 = arith.addf %47, %52 : vector<1x256xf32>
    %c0_40 = arith.constant 0 : index
    %c3_41 = arith.constant 3 : index
    %c0_42 = arith.constant 0 : index
    %54 = vector.load %arg2[%c0_40, %c3_41, %c0_42] : memref<1x4x256xf32, #tpu.memory_space<vmem>>, vector<1x1x256xf32>
    %55 = vector.shape_cast %54 : vector<1x1x256xf32> to vector<1x256xf32>
    %c1_43 = arith.constant 1 : index
    %c3_44 = arith.constant 3 : index
    %56 = memref.load %arg3[%c1_43, %c3_44] : memref<4x4xf32, #tpu.memory_space<smem>>
    %57 = vector.broadcast %56 : f32 to vector<1x256xf32>
    %58 = arith.mulf %55, %57 : vector<1x256xf32>
    %59 = arith.addf %53, %58 : vector<1x256xf32>
    %60 = math.tanh %59 : vector<1x256xf32>
    %cst_45 = arith.constant 1.000000e+00 : f32
    %61 = vector.broadcast %cst_45 : f32 to vector<1x256xf32>
    %62 = arith.subf %61, %60 : vector<1x256xf32>
    %cst_46 = arith.constant 5.000000e-01 : f32
    %63 = vector.broadcast %cst_46 : f32 to vector<1x256xf32>
    %64 = arith.mulf %62, %63 : vector<1x256xf32>
    %c0_47 = arith.constant 0 : index
    %c1_48 = arith.constant 1 : index
    %c0_49 = arith.constant 0 : index
    %65 = vector.load %arg4[%c0_47, %c1_48, %c0_49] : memref<1x4x256xf32, #tpu.memory_space<vmem>>, vector<1x1x256xf32>
    %66 = vector.shape_cast %65 : vector<1x1x256xf32> to vector<1x256xf32>
    %67 = arith.cmpf ole, %64, %66 : vector<1x256xf32>
    %cst_50 = arith.constant 1.000000e+00 : f32
    %cst_51 = arith.constant -1.000000e+00 : f32
    %68 = vector.broadcast %cst_50 : f32 to vector<1x256xf32>
    %69 = vector.broadcast %cst_51 : f32 to vector<1x256xf32>
    %70 = arith.select %67, %68, %69 : vector<1x256xi1>, vector<1x256xf32>
    %c0_52 = arith.constant 0 : index
    %c1_53 = arith.constant 1 : index
    %c0_54 = arith.constant 0 : index
    %71 = vector.load %arg5[%c0_52, %c1_53, %c0_54] : memref<1x4x256xf32, #tpu.memory_space<vmem>>, vector<1x1x256xf32>
    %72 = vector.shape_cast %71 : vector<1x1x256xf32> to vector<1x256xf32>
    %73 = vector.shape_cast %70 : vector<1x256xf32> to vector<1x1x256xf32>
    tpu.vector_store %arg5[%c0_52, %c1_53, %c0_54], %73 {strides = array<i32>} : memref<1x4x256xf32, #tpu.memory_space<vmem>>, vector<1x1x256xf32>,
    %c0_55 = arith.constant 0 : index
    %c0_56 = arith.constant 0 : index
    %c0_57 = arith.constant 0 : index
    %74 = vector.load %arg2[%c0_55, %c0_56, %c0_57] : memref<1x4x256xf32, #tpu.memory_space<vmem>>, vector<1x1x256xf32>
    %75 = vector.shape_cast %74 : vector<1x1x256xf32> to vector<1x256xf32>
    %c2_58 = arith.constant 2 : index
    %c0_59 = arith.constant 0 : index
    %76 = memref.load %arg3[%c2_58, %c0_59] : memref<4x4xf32, #tpu.memory_space<smem>>
    %77 = vector.broadcast %76 : f32 to vector<1x256xf32>
    %78 = arith.mulf %75, %77 : vector<1x256xf32>
    %c0_60 = arith.constant 0 : index
    %c1_61 = arith.constant 1 : index
    %c0_62 = arith.constant 0 : index
    %79 = vector.load %arg2[%c0_60, %c1_61, %c0_62] : memref<1x4x256xf32, #tpu.memory_space<vmem>>, vector<1x1x256xf32>
    %80 = vector.shape_cast %79 : vector<1x1x256xf32> to vector<1x256xf32>
    %c2_63 = arith.constant 2 : index
    %c1_64 = arith.constant 1 : index
    %81 = memref.load %arg3[%c2_63, %c1_64] : memref<4x4xf32, #tpu.memory_space<smem>>
    %82 = vector.broadcast %81 : f32 to vector<1x256xf32>
    %83 = arith.mulf %80, %82 : vector<1x256xf32>
    %84 = arith.addf %78, %83 : vector<1x256xf32>
    %c0_65 = arith.constant 0 : index
    %c2_66 = arith.constant 2 : index
    %c0_67 = arith.constant 0 : index
    %85 = vector.load %arg2[%c0_65, %c2_66, %c0_67] : memref<1x4x256xf32, #tpu.memory_space<vmem>>, vector<1x1x256xf32>
    %86 = vector.shape_cast %85 : vector<1x1x256xf32> to vector<1x256xf32>
    %c2_68 = arith.constant 2 : index
    %c2_69 = arith.constant 2 : index
    %87 = memref.load %arg3[%c2_68, %c2_69] : memref<4x4xf32, #tpu.memory_space<smem>>
    %88 = vector.broadcast %87 : f32 to vector<1x256xf32>
    %89 = arith.mulf %86, %88 : vector<1x256xf32>
    %90 = arith.addf %84, %89 : vector<1x256xf32>
    %c0_70 = arith.constant 0 : index
    %c3_71 = arith.constant 3 : index
    %c0_72 = arith.constant 0 : index
    %91 = vector.load %arg2[%c0_70, %c3_71, %c0_72] : memref<1x4x256xf32, #tpu.memory_space<vmem>>, vector<1x1x256xf32>
    %92 = vector.shape_cast %91 : vector<1x1x256xf32> to vector<1x256xf32>
    %c2_73 = arith.constant 2 : index
    %c3_74 = arith.constant 3 : index
    %93 = memref.load %arg3[%c2_73, %c3_74] : memref<4x4xf32, #tpu.memory_space<smem>>
    %94 = vector.broadcast %93 : f32 to vector<1x256xf32>
    %95 = arith.mulf %92, %94 : vector<1x256xf32>
    %96 = arith.addf %90, %95 : vector<1x256xf32>
    %97 = math.tanh %96 : vector<1x256xf32>
    %cst_75 = arith.constant 1.000000e+00 : f32
    %98 = vector.broadcast %cst_75 : f32 to vector<1x256xf32>
    %99 = arith.subf %98, %97 : vector<1x256xf32>
    %cst_76 = arith.constant 5.000000e-01 : f32
    %100 = vector.broadcast %cst_76 : f32 to vector<1x256xf32>
    %101 = arith.mulf %99, %100 : vector<1x256xf32>
    %c0_77 = arith.constant 0 : index
    %c2_78 = arith.constant 2 : index
    %c0_79 = arith.constant 0 : index
    %102 = vector.load %arg4[%c0_77, %c2_78, %c0_79] : memref<1x4x256xf32, #tpu.memory_space<vmem>>, vector<1x1x256xf32>
    %103 = vector.shape_cast %102 : vector<1x1x256xf32> to vector<1x256xf32>
    %104 = arith.cmpf ole, %101, %103 : vector<1x256xf32>
    %cst_80 = arith.constant 1.000000e+00 : f32
    %cst_81 = arith.constant -1.000000e+00 : f32
    %105 = vector.broadcast %cst_80 : f32 to vector<1x256xf32>
    %106 = vector.broadcast %cst_81 : f32 to vector<1x256xf32>
    %107 = arith.select %104, %105, %106 : vector<1x256xi1>, vector<1x256xf32>
    %c0_82 = arith.constant 0 : index
    %c2_83 = arith.constant 2 : index
    %c0_84 = arith.constant 0 : index
    %108 = vector.load %arg5[%c0_82, %c2_83, %c0_84] : memref<1x4x256xf32, #tpu.memory_space<vmem>>, vector<1x1x256xf32>
    %109 = vector.shape_cast %108 : vector<1x1x256xf32> to vector<1x256xf32>
    %110 = vector.shape_cast %107 : vector<1x256xf32> to vector<1x1x256xf32>
    tpu.vector_store %arg5[%c0_82, %c2_83, %c0_84], %110 {strides = array<i32>} : memref<1x4x256xf32, #tpu.memory_space<vmem>>, vector<1x1x256xf32>,
    %c0_85 = arith.constant 0 : index
    %c0_86 = arith.constant 0 : index
    %c0_87 = arith.constant 0 : index
    %111 = vector.load %arg2[%c0_85, %c0_86, %c0_87] : memref<1x4x256xf32, #tpu.memory_space<vmem>>, vector<1x1x256xf32>
    %112 = vector.shape_cast %111 : vector<1x1x256xf32> to vector<1x256xf32>
    %c3_88 = arith.constant 3 : index
    %c0_89 = arith.constant 0 : index
    %113 = memref.load %arg3[%c3_88, %c0_89] : memref<4x4xf32, #tpu.memory_space<smem>>
    %114 = vector.broadcast %113 : f32 to vector<1x256xf32>
    %115 = arith.mulf %112, %114 : vector<1x256xf32>
    %c0_90 = arith.constant 0 : index
    %c1_91 = arith.constant 1 : index
    %c0_92 = arith.constant 0 : index
    %116 = vector.load %arg2[%c0_90, %c1_91, %c0_92] : memref<1x4x256xf32, #tpu.memory_space<vmem>>, vector<1x1x256xf32>
    %117 = vector.shape_cast %116 : vector<1x1x256xf32> to vector<1x256xf32>
    %c3_93 = arith.constant 3 : index
    %c1_94 = arith.constant 1 : index
    %118 = memref.load %arg3[%c3_93, %c1_94] : memref<4x4xf32, #tpu.memory_space<smem>>
    %119 = vector.broadcast %118 : f32 to vector<1x256xf32>
    %120 = arith.mulf %117, %119 : vector<1x256xf32>
    %121 = arith.addf %115, %120 : vector<1x256xf32>
    %c0_95 = arith.constant 0 : index
    %c2_96 = arith.constant 2 : index
    %c0_97 = arith.constant 0 : index
    %122 = vector.load %arg2[%c0_95, %c2_96, %c0_97] : memref<1x4x256xf32, #tpu.memory_space<vmem>>, vector<1x1x256xf32>
    %123 = vector.shape_cast %122 : vector<1x1x256xf32> to vector<1x256xf32>
    %c3_98 = arith.constant 3 : index
    %c2_99 = arith.constant 2 : index
    %124 = memref.load %arg3[%c3_98, %c2_99] : memref<4x4xf32, #tpu.memory_space<smem>>
    %125 = vector.broadcast %124 : f32 to vector<1x256xf32>
    %126 = arith.mulf %123, %125 : vector<1x256xf32>
    %127 = arith.addf %121, %126 : vector<1x256xf32>
    %c0_100 = arith.constant 0 : index
    %c3_101 = arith.constant 3 : index
    %c0_102 = arith.constant 0 : index
    %128 = vector.load %arg2[%c0_100, %c3_101, %c0_102] : memref<1x4x256xf32, #tpu.memory_space<vmem>>, vector<1x1x256xf32>
    %129 = vector.shape_cast %128 : vector<1x1x256xf32> to vector<1x256xf32>
    %c3_103 = arith.constant 3 : index
    %c3_104 = arith.constant 3 : index
    %130 = memref.load %arg3[%c3_103, %c3_104] : memref<4x4xf32, #tpu.memory_space<smem>>
    %131 = vector.broadcast %130 : f32 to vector<1x256xf32>
    %132 = arith.mulf %129, %131 : vector<1x256xf32>
    %133 = arith.addf %127, %132 : vector<1x256xf32>
    %134 = math.tanh %133 : vector<1x256xf32>
    %cst_105 = arith.constant 1.000000e+00 : f32
    %135 = vector.broadcast %cst_105 : f32 to vector<1x256xf32>
    %136 = arith.subf %135, %134 : vector<1x256xf32>
    %cst_106 = arith.constant 5.000000e-01 : f32
    %137 = vector.broadcast %cst_106 : f32 to vector<1x256xf32>
    %138 = arith.mulf %136, %137 : vector<1x256xf32>
    %c0_107 = arith.constant 0 : index
    %c3_108 = arith.constant 3 : index
    %c0_109 = arith.constant 0 : index
    %139 = vector.load %arg4[%c0_107, %c3_108, %c0_109] : memref<1x4x256xf32, #tpu.memory_space<vmem>>, vector<1x1x256xf32>
    %140 = vector.shape_cast %139 : vector<1x1x256xf32> to vector<1x256xf32>
    %141 = arith.cmpf ole, %138, %140 : vector<1x256xf32>
    %cst_110 = arith.constant 1.000000e+00 : f32
    %cst_111 = arith.constant -1.000000e+00 : f32
    %142 = vector.broadcast %cst_110 : f32 to vector<1x256xf32>
    %143 = vector.broadcast %cst_111 : f32 to vector<1x256xf32>
    %144 = arith.select %141, %142, %143 : vector<1x256xi1>, vector<1x256xf32>
    %c0_112 = arith.constant 0 : index
    %c3_113 = arith.constant 3 : index
    %c0_114 = arith.constant 0 : index
    %145 = vector.load %arg5[%c0_112, %c3_113, %c0_114] : memref<1x4x256xf32, #tpu.memory_space<vmem>>, vector<1x1x256xf32>
    %146 = vector.shape_cast %145 : vector<1x1x256xf32> to vector<1x256xf32>
    %147 = vector.shape_cast %144 : vector<1x256xf32> to vector<1x1x256xf32>
    tpu.vector_store %arg5[%c0_112, %c3_113, %c0_114], %147 {strides = array<i32>} : memref<1x4x256xf32, #tpu.memory_space<vmem>>, vector<1x1x256xf32>,
    return
  }
  func.func @transform_0(%arg0: i32, %arg1: i32) -> (i32, i32, i32) {
    %c0_i32 = arith.constant 0 : i32
    %c0_i32_0 = arith.constant 0 : i32
    return %arg0, %c0_i32, %arg1 : i32, i32, i32
  }
  func.func @transform_1(%arg0: i32, %arg1: i32) -> (i32, i32) {
    %c0_i32 = arith.constant 0 : i32
    %c0_i32_0 = arith.constant 0 : i32
    %c0_i32_1 = arith.constant 0 : i32
    return %c0_i32, %c0_i32_0 : i32, i32
  }
  func.func @transform_2(%arg0: i32, %arg1: i32) -> (i32, i32, i32) {
    %c0_i32 = arith.constant 0 : i32
    %c0_i32_0 = arith.constant 0 : i32
    return %arg0, %c0_i32, %arg1 : i32, i32, i32
  }
  func.func @transform_3(%arg0: i32, %arg1: i32) -> (i32, i32, i32) {
    %c0_i32 = arith.constant 0 : i32
    %c0_i32_0 = arith.constant 0 : i32
    return %arg0, %c0_i32, %arg1 : i32, i32, i32
  }
}

</mosaic_0001>

<bundles_post_ra>
// kernel: tpu_custom_call.1
= control target key start
LH: loop header
LB: loop body
LE: loop exit
PB: predicated region body
PF: predicated region fallthrough
CT: control target
= control target key end

     0   :  { %s1053_s0 = inlined_call_operand.hbm [shape: f32[2,4,256], index: 0, kind: input, shape index: {}]   ;;  %s1054_s1 = inlined_call_operand.hbm [shape: f32[4,4], index: 1, kind: input, shape index: {}]   ;;  %s1055_s2 = inlined_call_operand.hbm [shape: f32[2,4,256], index: 2, kind: input, shape index: {}]   ;;  %s1056_s3 = inlined_call_operand.hbm [shape: f32[2,4,256], index: 3, kind: output, shape index: {}]  }
   0x1   :  { %1058 = sst [smem:[#allocation15_spill]] %s1054_s1 }
   0x2   :  { %8 = vsyncpa [#allocation3], 0 }
   0x3   :  { %10 = vsyncpa [#allocation3 + $0x1], 0 }
   0x4   :  { %11 = vsyncpa [#allocation5], 0 }
   0x5   :  { %12 = vsyncpa [#allocation8], 0 }
   0x6   :  { %14 = vsyncpa [#allocation8 + $0x1], 0 }
   0x7   :  { %15 = vsyncpa [#allocation4], 0 }
   0x8   :  { %17 = vsyncpa [#allocation4 + $0x1], 0  ;;  %s859_s12 = smov 0   ;;  %s861_s13 = smov 0  }
   0x9   :  { %s863_s14 = smov 0   ;;  %s865_s15 = smov 0  }
   0xa   :  { %s867_s16 = smov 0   ;;  %s869_s17 = smov 0  }
   0xb LB: > { %s526_s18 = sadd.s32 4294967295, %s835_s17   ;;  %s527_s19 = sadd.s32 4294967294, %s835_s17   ;;  %s835_s17 = sphi %s869_s17, %s23_s17   ;;  %s831_s16 = sphi %s867_s16, %s1075_s16   ;;  %s827_s15 = sphi %s865_s15, %s1074_s15   ;;  %s823_s14 = sphi %s863_s14, %s1073_s14   ;;  %s819_s13 = sphi %s861_s13, %s1072_s13   ;;  %s815_s12 = sphi %s859_s12, %s1071_s12  }
   0xc   : > { %p57_p0 = scmp.ne.s32.totalorder %s819_s13, %s815_s12  ;;  %p893_p1 = scmp.eq.s32.totalorder %s526_s18, 0 }
   0xd   : > { %p897_p2 = scmp.eq.s32.totalorder %s526_s18, 1  ;;  %p138_p3 = scmp.eq.s32.totalorder %s527_s19, 1 }
   0xe   : > { %p903_p4 = por %p893_p1, %p57_p0  ;;  %p528_p5 = scmp.ge.s32.totalorder %s835_s17, 1 }
   0xf   : > { %p908_p6 = por %p138_p3, %p57_p0  ;;  %p145_p7 = scmp.lt.s32.totalorder %s835_s17, 3 }
  0x10   : > { %s1063_s1 = sld [smem:[#allocation15_spill]]  ;;  %s35_s28 = sadd.s32 1, %s831_s16 }
  0x11   : > { %p916_p8 = pnand %p528_p5, %p145_p7  ;;  %s44_s29 = sadd.s32 1, %s823_s14 }
  0x12   : > { %p37_p12 = scmp.ge.s32.totalorder %s35_s28, 2  ;;  %s837_s30 = smov [#allocation6]  }
  0x13   : > { %p593_p10 = pneg %p916_p8  ;;  %p51_p13 = scmp.ne.s32.totalorder %s823_s14, %s819_s13 }
  0x14   : > { %s1077_s28 = smov (%p37_p12, %s35_s28), 0  ;;  %p52_p0 = scmp.eq.s32.totalorder %s835_s17, 0 }
  0x15   : > { %p594_p11 = pnand %p593_p10, %p893_p1  ;;  %1065 = sst [smem:[#allocation14_spill]] %s1077_s28 }
  0x16   : > { %s157_s26 = sshll.u32 %s1063_s1, 4  ;;  %s39_s4 = ssub.s32 %s831_s16, %s1077_s28  ;;  %s158_s26 = int_to_ptr.hbm [resolvable:$true] %s157_s26 }
  0x17   : > { %596 = dma.hbm_to_smem (!%p594_p11), %s158_s26, 64, %s837_s30, [#allocation5]  }
  0x18   : > { %p609_p3 = scmp.lt.s32.totalorder %s835_s17, 2  ;;  %p42_p5 = scmp.eq.s32.totalorder %s39_s4, 0 }
  0x19   : > { %p53_p7 = por %p52_p0, %p51_p13  ;;  %p937_p9 = por %p897_p2, %p51_p13 }
  0x1a   : > { %s168_s6 = sand.u32 1, %s823_s14   ;;  %s580_s9 = sshll.u32 %s831_s16, 3 }
  0x1b   : > { %s943_s7 = scalar_select %p42_p5, %s823_s14, %s44_s29  }
  0x1c   : > { %s531_s8 = sshll.u32 %s168_s6, 3  ;;  %s179_s18 = scalar_lea.hbm %s1053_s0, %s580_s9 }
  0x1d   : > { %s172_s19 = scalar_lea.vmem [#allocation2], %s531_s8  ;;  %s181_s25 = sshll.u32 %s179_s18, 4  ;;  %s182_s25 = int_to_ptr.hbm [resolvable:$true] %s181_s25 }
  0x1e   : > { %s183_s24 = sshll.u32 %s172_s19, 4  ;;  %p598_p10 = pnand %p609_p3, %p53_p7  ;;  %s184_s24 = int_to_ptr.vmem [resolvable:$true] %s183_s24 }
  0x1f   : > { %s201_s30 = scalar_lea.hbm %s1055_s2, %s580_s9  ;;  %s169_s4 = scalar_lea.sflag [#allocation3], %s168_s6 }
  0x20   : > { %600 = dma.hbm_to_vmem [thread:$0]  (!%p598_p10), %s182_s25, 128, %s184_s24, %s169_s4  }
  0x21   : > { %s203_s29 = sshll.u32 %s201_s30, 4  ;;  %s194_s1 = scalar_lea.vmem [#allocation7], %s531_s8  ;;  %s204_s29 = int_to_ptr.hbm [resolvable:$true] %s203_s29 }
  0x22   : > { %s205_s28 = sshll.u32 %s194_s1, 4  ;;  %s191_s10 = scalar_lea.sflag [#allocation8], %s168_s6  ;;  %s206_s28 = int_to_ptr.vmem [resolvable:$true] %s205_s28 }
  0x23   : > { %603 = dma.hbm_to_vmem [thread:$0]  (!%p598_p10), %s204_s29, 128, %s206_s28, %s191_s10  }
  0x24   : > { %214 = sbr.rel (%p916_p8) target bundleno = 92 (0x5c), region = 32  ;;  %s957_s11 = sand.u32 (!%p916_p8), 1, %s819_s13  }
  0x25   : > { %s960_s18 = sshll.u32 (!%p916_p8), %s957_s11, 3  ;;  %s217_s9 = scalar_lea.sflag (!%p916_p8), [#allocation3], %s957_s11 }
  0x26   : > { %s964_s19 = scalar_lea.vmem (!%p916_p8), [#allocation2], %s960_s18 }
  0x29   : > { %798 = dma.done.wait (%p903_p4), %s217_s9, 128  }
  0x2a   : > { %800 = vsyncadd (%p903_p4), %s217_s9, 4294967168 }
  0x2b   : > { %802 = dma.done.wait (%p893_p1), [#allocation5], 64  }
  0x2c   : > { %804 = vsyncadd (%p893_p1), [#allocation5], 4294967232  ;;  %s232_s1 = scalar_lea.sflag [#allocation8], %s957_s11  ;;  %s976_s27 = scalar_lea.vmem [#allocation7], %s960_s18 }
  0x2d   : > { %806 = dma.done.wait (%p903_p4), %s232_s1, 128  }
  0x2e   : > { %808 = vsyncadd (%p903_p4), %s232_s1, 4294967168 }
  0x2f   : > { %241 = sfence }
  0x30   : > { %s269_s28 = sld [smem:[#allocation6]]  ;;  %v268_v0 = vld [vmem:[%s964_s19] ss:$4 sm:$0x3]  ;;  %v296_v52 = vlaneseq }
  0x31   : > { %s543_s6 = sld [smem:[#allocation6 + $0x1]]  ;;  %v542_v1 = vld [vmem:[%s964_s19 + $0x1] ss:$4 sm:$0x3] }
  0x32   : > { %s545_s20 = sld [smem:[#allocation6 + $0x2]]  ;;  %v544_v3 = vld [vmem:[%s964_s19 + $0x2] ss:$4 sm:$0x3]  ;;  %vm999_vm0 = vcmp.lt.s32.totalorder %v296_v52, 256 }
  0x33   : > { %s547_s8 = sld [smem:[#allocation6 + $0x3]]  ;;  %v546_v6 = vld [vmem:[%s964_s19 + $0x3] ss:$4 sm:$0x3] }
  0x34   : > { %s548_s24 = sld [smem:[#allocation6 + $0x80]]  ;;  %v301_v11 = vld [vmem:[%s964_s19] ss:$4 sm:$0x3] }
  0x35   : > { %s550_s25 = sld [smem:[#allocation6 + $0x81]]  ;;  %v549_v14 = vld [vmem:[%s964_s19 + $0x1] ss:$4 sm:$0x3] }
  0x36   : > { %v270_v2 = vstv %s269_s28  ;;  %s552_s22 = sld [smem:[#allocation6 + $0x82]]  ;;  %v551_v16 = vld [vmem:[%s964_s19 + $0x2] ss:$4 sm:$0x3] }
  0x37   : > { %v271_v4 = vmul.f32 %v270_v2, %v268_v0  ;;  %v275_v5 = vstv %s543_s6  ;;  %s554_s21 = sld [smem:[#allocation6 + $0x83]]  ;;  %v553_v20 = vld [vmem:[%s964_s19 + $0x3] ss:$4 sm:$0x3]  ;;  %v838_v2 = vmov -1.0   ;;  %s582_s6 = sshll.u32 %s827_s15, 3 }
  0x38   : > { %v276_v7 = vmul.f32 %v542_v1, %v275_v5  ;;  %v281_v8 = vstv %s545_s20  ;;  %s557_s26 = sld [smem:[#allocation6 + $0x100]]  ;;  %v329_v23 = vld [vmem:[%s964_s19] ss:$4 sm:$0x3] }
  0x39   : > { %v282_v9 = vmul.f32 %v544_v3, %v281_v8  ;;  %v287_v10 = vstv %s547_s8  ;;  %s559_s30 = sld [smem:[#allocation6 + $0x101]]  ;;  %v558_v27 = vld [vmem:[%s964_s19 + $0x1] ss:$4 sm:$0x3] }
  0x3a   : > { %v277_v12 = vadd.f32 %v276_v7, %v271_v4  ;;  %v288_v13 = vmul.f32 %v546_v6, %v287_v10  ;;  %v303_v15 = vstv %s548_s24  ;;  %s561_s4 = sld [smem:[#allocation6 + $0x102]]  ;;  %v560_v31 = vld [vmem:[%s964_s19 + $0x2] ss:$4 sm:$0x3] }
  0x3b   : > { %v304_v18 = vmul.f32 %v303_v15, %v301_v11  ;;  %v307_v19 = vstv %s550_s25  ;;  %s563_s29 = sld [smem:[#allocation6 + $0x103]]  ;;  %v562_v34 = vld [vmem:[%s964_s19 + $0x3] ss:$4 sm:$0x3]  ;;  %s386_s25 = scalar_lea.sflag [#allocation4], %s957_s11 }
  0x3c   : > { %v283_v17 = vadd.f32 %v282_v9, %v277_v12  ;;  %v308_v21 = vmul.f32 %v549_v14, %v307_v19  ;;  %v312_v22 = vstv %s552_s22  ;;  %s566_s10 = sld [smem:[#allocation6 + $0x180]]  ;;  %v357_v40 = vld [vmem:[%s964_s19] ss:$4 sm:$0x3] }
  0x3d   : > { %v313_v25 = vmul.f32 %v551_v16, %v312_v22  ;;  %v317_v26 = vstv %s554_s21  ;;  %s568_s9 = sld [smem:[#allocation6 + $0x181]]  ;;  %v567_v44 = vld [vmem:[%s964_s19 + $0x1] ss:$4 sm:$0x3] }
  0x3e   : > { %v289_v24 = vadd.f32 %v288_v13, %v283_v17  ;;  %v309_v28 = vadd.f32 %v308_v21, %v304_v18  ;;  %v318_v29 = vmul.f32 %v553_v20, %v317_v26  ;;  %v331_v30 = vstv %s557_s26  ;;  %s570_s1 = sld [smem:[#allocation6 + $0x182]]  ;;  %v569_v46 = vld [vmem:[%s964_s19 + $0x2] ss:$4 sm:$0x3] }
  0x3f   : > { %v332_v32 = vmul.f32 %v331_v30, %v329_v23  ;;  %v335_v33 = vstv %s559_s30  ;;  %s572_s28 = sld [smem:[#allocation6 + $0x183]]  ;;  %v571_v50 = vld [vmem:[%s964_s19 + $0x3] ss:$4 sm:$0x3]  ;;  %s264_s19 = scalar_lea.vmem [#allocation9], %s960_s18 }
  0x40   : > { %662 = vtanh.f32 %v289_v24  ;;  %v314_v35 = vadd.f32 %v313_v25, %v309_v28  ;;  %v336_v36 = vmul.f32 %v558_v27, %v335_v33  ;;  %v340_v37 = vstv %s561_s4  ;;  %v293_v59 = vld [vmem:[%s976_s27] ss:$4 sm:$0x3]  ;;  %v555_v6 = vld [vmem:[%s976_s27 + $0x1] ss:$4 sm:$0x3]  ;;  %s399_s18 = scalar_lea.hbm %s1056_s3, %s582_s6 }
  0x41   : > { %v341_v38 = vmul.f32 %v560_v31, %v340_v37  ;;  %v345_v39 = vstv %s563_s29  ;;  %v564_v11 = vld [vmem:[%s976_s27 + $0x2] ss:$4 sm:$0x3]  ;;  %s401_s24 = sshll.u32 %s264_s19, 4  ;;  %s403_s15 = sshll.u32 %s399_s18, 4  ;;  %s402_s24 = int_to_ptr.vmem [resolvable:$true] %s401_s24  ;;  %s404_s15 = int_to_ptr.hbm [resolvable:$true] %s403_s15 }
  0x42   : > { %v319_v41 = vadd.f32 %v318_v29, %v314_v35  ;;  %v337_v42 = vadd.f32 %v336_v36, %v332_v32  ;;  %v346_v43 = vmul.f32 %v562_v34, %v345_v39  ;;  %v359_v45 = vstv %s566_s10  ;;  %v573_v16 = vld [vmem:[%s976_s27 + $0x3] ss:$4 sm:$0x3]  ;;  %s759_s22 = sshra.s32 %s404_s15, 4  ;;  %s765_s27 = scalar_lea.hbm %s1056_s3, 16  ;;  %s760_s22 = int_to_ptr.hbm [resolvable:$true] %s759_s22 }
  0x43   : > { %v360_v48 = vmul.f32 %v359_v45, %v357_v40  ;;  %v363_v49 = vstv %s568_s9  ;;  %s761_s21 = scalar_lea.hbm %s760_s22, 8  ;;  %p766_p8 = scmp.lt.s32.totalorder %s760_s22, %s1056_s3 }
  0x44   : > { %664 = vtanh.f32 %v319_v41  ;;  %v342_v47 = vadd.f32 %v341_v38, %v337_v42  ;;  %v364_v53 = vmul.f32 %v567_v44, %v363_v49  ;;  %v368_v54 = vstv %s570_s1  ;;  %p762_p1 = scmp.ne.s32.totalorder %s760_s22, %s761_s21  ;;  %p767_p11 = scmp.lt.s32.totalorder %s765_s27, %s761_s21 }
  0x45   : > { %v369_v57 = vmul.f32 %v569_v46, %v368_v54  ;;  %v373_v58 = vstv %s572_s28 }
  0x46   : > { %v663_v51 = vpop.eup %662  ;;  %v347_v56 = vadd.f32 %v346_v43, %v342_v47  ;;  %v365_v60 = vadd.f32 %v364_v53, %v360_v48  ;;  %v374_v61 = vmul.f32 %v571_v50, %v373_v58  ;;  %p763_p2 = pnand %p762_p1, %p937_p9  ;;  %p768_p12 = por %p767_p11, %p766_p8 }
  0x47   : > { %v291_v55 = vsub.f32 1.0, %v663_v51 }
  0x48   : > { %666 = vtanh.f32 %v347_v56  ;;  %v370_v0 = vadd.f32 %v369_v57, %v365_v60  ;;  %p764_p4 = pneg %p763_p2 }
  0x49   : > { %v292_v62 = vmul.f32 0.5, %v291_v55 }
  0x4a   : > { %v665_v1 = vpop.eup %664  ;;  %v375_v5 = vadd.f32 %v374_v61, %v370_v0  ;;  %p769_p13 = pnand %p768_p12, %p764_p4 }
  0x4b   : > { %vm294_vm1 = vcmp.le.f32.partialorder %v292_v62, %v293_v59  ;;  %v321_v4 = vsub.f32 1.0, %v665_v1 }
  0x4c   : > { %v295_v3 = vsel %vm294_vm1, 1.0, %v838_v2  ;;  %668 = vtanh.f32 %v375_v5 }
  0x4d   : > { %300 = vst.msk [vmem:[%s264_s19] ss:$4 sm:$0x3] %vm999_vm0, %v295_v3  ;;  %v322_v7 = vmul.f32 0.5, %v321_v4 }
  0x4e   : > { %v667_v8 = vpop.eup %666 }
  0x4f   : > { %vm325_vm2 = vcmp.le.f32.partialorder %v322_v7, %v555_v6  ;;  %v349_v9 = vsub.f32 1.0, %v667_v8 }
  0x50   : > { %v326_v10 = vsel %vm325_vm2, 1.0, %v838_v2 }
  0x51   : > { %556 = vst.msk [vmem:[%s264_s19 + $0x1] ss:$4 sm:$0x3] %vm999_vm0, %v326_v10  ;;  %v350_v12 = vmul.f32 0.5, %v349_v9 }
  0x52   : > { %v669_v13 = vpop.eup %668 }
  0x53   : > { %vm353_vm3 = vcmp.le.f32.partialorder %v350_v12, %v564_v11  ;;  %v377_v15 = vsub.f32 1.0, %v669_v13 }
  0x54   : > { %v354_v14 = vsel %vm353_vm3, 1.0, %v838_v2 }
  0x55   : > { %565 = vst.msk [vmem:[%s264_s19 + $0x2] ss:$4 sm:$0x3] %vm999_vm0, %v354_v14  ;;  %v378_v17 = vmul.f32 0.5, %v377_v15 }
  0x57   : > { %vm381_vm4 = vcmp.le.f32.partialorder %v378_v17, %v573_v16 }
  0x58   : > { %v382_v18 = vsel %vm381_vm4, 1.0, %v838_v2 }
  0x59   : > { %574 = vst.msk [vmem:[%s264_s19 + $0x3] ss:$4 sm:$0x3] %vm999_vm0, %v382_v18 }
  0x5a   : > { %772 = shalt.err (!%p769_p13)
}
  0x5b   : > { %591 = dma.vmem_to_hbm [thread:$0]  (%p937_p9), %s402_s24, 128, %s404_s15, %s386_s25  }
  0x5c PF: > { %s415_s11 = sand.u32 1, %s815_s12   ;;  %p1069_p0 = scmp.ge.s32.totalorder %s835_s17, 2 }
  0x5d   : > { %s416_s10 = scalar_lea.sflag [#allocation4], %s415_s11 }
  0x5e   : > { %p605_p3 = pnand %p1069_p0, %p908_p6 }
  0x60   : > { %p606_p5 = pneg %p605_p3 }
  0x62   : > { %810 = dma.done.wait (%p606_p5), %s416_s10, 128  }
  0x63   : > { %812 = vsyncadd (%p606_p5), %s416_s10, 4294967168  ;;  %s23_s17 = sadd.s32 1, %s835_s17   ;;  %s1070_s5 = sld [smem:[#allocation14_spill]] }
  0x64   : > { %p20_p7 = scmp.ge.s32.totalorder %s23_s17, 4   ;;  %s1071_s12 = smov %s819_s13 }
  0x65   : > { %s1072_s13 = smov %s823_s14  ;;  %s1073_s14 = smov %s943_s7 }
  0x66   : > { %s1074_s15 = smov %s831_s16  ;;  %22 = sbr.rel (!%p20_p7) target bundleno = 11 (0xb), region = 104 }
  0x69   : > { %s1075_s16 = smov %s1070_s5 }
  0x6b   :  { %422 = vsyncpa [#allocation3], 1 }
  0x6c   :  { %424 = vsyncpa [#allocation3 + $0x1], 1 }
  0x6d   :  { %425 = vsyncpa [#allocation8], 1 }
  0x6e   :  { %427 = vsyncpa [#allocation8 + $0x1], 1 }
  0x6f   :  { %428 = vsyncpa [#allocation4], 1 }
  0x70   :  { %430 = vsyncpa [#allocation4 + $0x1], 1 }
  0x71   :  { %431 = vsyncpa [#allocation5], 1 }
  0x72   :  { %433 = vsyncpa [#allocation5 + $0x1], 1 }

</bundles_post_ra>
